<compile_context>
chip_gen: v7x
topology: tpu7x:2x2x1
jax: 0.10.0
libtpu: 0.0.40
codegen_flags: <defaults>
</compile_context>

<pallas_src>
import jax
import jax.numpy as jnp
import numpy as np
from jax.experimental import pallas as pl
from jax.experimental.pallas import tpu as pltpu

hidden_size = 256
input_size = 486 * 2      # 972
output_size = 52

PAD_OUT = 128             # 52 -> 128: lane-dense, unmasked output stores
MAX_BLOCK_B = 1024        # x rows per grid step; fits v5e's 16 MiB default scoped VMEM
SPLIT_BATCH = 256         # above this, force >= 2 grid steps (v7x megacore sharding)
SMALL_BATCH_FAST_PATH = 128


def _round_up(n, m):
    return (n + m - 1) // m * m


def fused_mlp_kernel(x_ref, w_ref, b_ref, o_ref):
    # (bb, 972) @ (972, 128) + (1, 128) -> (bb, 128); bf16 MXU, f32 accumulation.
    x = x_ref[...]
    if x.dtype != jnp.bfloat16:
        x = x.astype(jnp.bfloat16)   # in-VMEM cast: no extra HBM pass over x
    acc = jnp.dot(x, w_ref[...], preferred_element_type=jnp.float32)
    o_ref[...] = (acc + b_ref[...]).astype(o_ref.dtype)


def fuse_and_pad_params(w1, b1, w2, b2):
    """Fold fc2 into fc1 (no activation between them) and pad N to 128 lanes.

    Returns:
      w_fused: (input_size, PAD_OUT) bf16, zero-padded (w1 @ w2)
      b_fused: (1, PAD_OUT)          f32, zero-padded (b1 @ w2 + b2)
    """
    w = jnp.dot(w1, w2, preferred_element_type=jnp.float32)       # (972, 52)
    b = jnp.dot(b1, w2, preferred_element_type=jnp.float32) + b2  # (1, 52)
    w_fused = jnp.pad(w, ((0, 0), (0, PAD_OUT - output_size))).astype(jnp.bfloat16)
    b_fused = jnp.pad(b, ((0, 0), (0, PAD_OUT - output_size)))
    return w_fused, b_fused


def _pick_block_b(batch):
    # Multiple of 8 (sublanes); >= 2 grid steps once batch > SPLIT_BATCH so the
    # "parallel" batch axis can shard across both TensorCores on v7x.
    target = batch if batch <= SPLIT_BATCH else -(-batch // 2)
    return min(MAX_BLOCK_B, _round_up(max(target, 1), 8))


@jax.jit
def mlp_forward_pallas(x, w_fused, b_fused):
    batch = x.shape[0]
    bb = _pick_block_b(batch)
    grid = (pl.cdiv(batch, bb),)   # ragged last tile -> masked output stores

    out_pad = pl.pallas_call(
        fused_mlp_kernel,
        out_shape=jax.ShapeDtypeStruct((batch, PAD_OUT), jnp.float32),
        grid=grid,
        in_specs=[
            pl.BlockSpec((bb, input_size), lambda i: (i, 0)),       # x: tiled on batch, full K
            pl.BlockSpec((input_size, PAD_OUT), lambda i: (0, 0)),  # W: VMEM-resident
            pl.BlockSpec((1, PAD_OUT), lambda i: (0, 0)),           # b: VMEM-resident
        ],
        out_specs=pl.BlockSpec((bb, PAD_OUT), lambda i: (i, 0)),
        compiler_params=pltpu.CompilerParams(
            dimension_semantics=("parallel",),
        ),
    )(x, w_fused, b_fused)

    return out_pad[:, :output_size]


@jax.jit
def _mlp_forward_xla(x, w_fused, b_fused):
    # Small-batch fast path: single fused XLA dot, no pallas launch overhead.
    y = jnp.dot(x.astype(jnp.bfloat16), w_fused,
                preferred_element_type=jnp.float32) + b_fused
    return y[:, :output_size]


def mlp_forward(x, w_fused, b_fused, *, force_pallas=False):
    if x.shape[0] <= SMALL_BATCH_FAST_PATH and not force_pallas:
        return _mlp_forward_xla(x, w_fused, b_fused)
    return mlp_forward_pallas(x, w_fused, b_fused)


def init_params(key):
    # Deterministic init mimicking nn.Linear's U(-1/sqrt(fan_in), 1/sqrt(fan_in)).
    k1, k2, k3, k4 = jax.random.split(key, 4)
    bound1 = 1.0 / np.sqrt(input_size)
    bound2 = 1.0 / np.sqrt(hidden_size)
    w1 = jax.random.uniform(k1, (input_size, hidden_size), jnp.float32, -bound1, bound1)
    b1 = jax.random.uniform(k2, (1, hidden_size), jnp.float32, -bound1, bound1)
    w2 = jax.random.uniform(k3, (hidden_size, output_size), jnp.float32, -bound2, bound2)
    b2 = jax.random.uniform(k4, (1, output_size), jnp.float32, -bound2, bound2)
    return w1, b1, w2, b2


if __name__ == "__main__":
    key = jax.random.PRNGKey(0)
    kx, kx2, kp = jax.random.split(key, 3)
    w1, b1, w2, b2 = init_params(kp)

    # Fuse/pad parameters once (amortized across every forward call).
    w_fused, b_fused = jax.block_until_ready(fuse_and_pad_params(w1, b1, w2, b2))

    # Small batch: force the Pallas kernel (the dispatcher would use the XLA
    # fast path here), then also check the fast path itself.
    batch = 8
    x = jax.random.normal(kx, (batch, input_size), jnp.float32)
    ref = (x @ w1 + b1) @ w2 + b2

    out = jax.block_until_ready(mlp_forward(x, w_fused, b_fused, force_pallas=True))
    assert out.shape == (batch, output_size)
    np.testing.assert_allclose(np.asarray(out), np.asarray(ref), rtol=2e-2, atol=2e-2)

    out_fast = jax.block_until_ready(mlp_forward(x, w_fused, b_fused))
    np.testing.assert_allclose(np.asarray(out_fast), np.asarray(ref), rtol=2e-2, atol=2e-2)

    # Larger, ragged batch: exercises the 2-step "parallel" grid and the masked
    # final tile (bb = 152, grid = (2,), rows 300..303 of the last block masked).
    batch2 = 300
    x2 = jax.random.normal(kx2, (batch2, input_size), jnp.float32)
    ref2 = (x2 @ w1 + b1) @ w2 + b2
    out2 = jax.block_until_ready(mlp_forward(x2, w_fused, b_fused))
    assert out2.shape == (batch2, output_size)
    np.testing.assert_allclose(np.asarray(out2), np.asarray(ref2), rtol=2e-2, atol=2e-2)

    print("KERNEL_OK")
</pallas_src>

<mosaic_0001>
module attributes {stable_mosaic.version = 11 : i64} {
  func.func @fused_mlp_kernel(%arg0: i32, %arg1: memref<8x972xf32, #tpu.memory_space<vmem>>, %arg2: memref<972x128xbf16, #tpu.memory_space<vmem>>, %arg3: memref<1x128xf32, #tpu.memory_space<vmem>>, %arg4: memref<8x128xf32, #tpu.memory_space<vmem>>) attributes {dimension_semantics = [#tpu.dimension_semantics<parallel>], iteration_bounds = array<i64: 1>, scalar_prefetch = 0 : i64, scratch_operands = 0 : i64, tpu.core_type = #tpu.core_type<tc>, window_params = [{transform_indices = @transform_0, window_bounds = array<i64: 8, 972>}, {pipeline_mode = #tpu.pipeline_mode<synchronous>, transform_indices = @transform_1, window_bounds = array<i64: 972, 128>}, {pipeline_mode = #tpu.pipeline_mode<synchronous>, transform_indices = @transform_2, window_bounds = array<i64: 1, 128>}, {transform_indices = @transform_3, window_bounds = array<i64: 8, 128>}]} {
    %c0 = arith.constant 0 : index
    %c0_0 = arith.constant 0 : index
    %0 = vector.load %arg1[%c0, %c0_0] : memref<8x972xf32, #tpu.memory_space<vmem>>, vector<8x972xf32>
    %1 = arith.truncf %0 : vector<8x972xf32> to vector<8x972xbf16>
    %c0_1 = arith.constant 0 : index
    %c0_2 = arith.constant 0 : index
    %2 = vector.load %arg2[%c0_1, %c0_2] : memref<972x128xbf16, #tpu.memory_space<vmem>>, vector<972x128xbf16>
    %cst = arith.constant dense<0.000000e+00> : vector<8x128xf32>
    %3 = tpu.matmul %1, %2, %cst {dimension_numbers = #tpu.dot_dimension_numbers<[1], [0], [0], [1], [0, 0, 1, 1], [], []>} : vector<8x972xbf16>, vector<972x128xbf16>, vector<8x128xf32> -> vector<8x128xf32>
    %c0_3 = arith.constant 0 : index
    %c0_4 = arith.constant 0 : index
    %4 = vector.load %arg3[%c0_3, %c0_4] : memref<1x128xf32, #tpu.memory_space<vmem>>, vector<1x128xf32>
    %5 = vector.broadcast %4 : vector<1x128xf32> to vector<8x128xf32>
    %6 = arith.addf %3, %5 : vector<8x128xf32>
    %c0_5 = arith.constant 0 : index
    %c0_6 = arith.constant 0 : index
    %7 = vector.load %arg4[%c0_5, %c0_6] : memref<8x128xf32, #tpu.memory_space<vmem>>, vector<8x128xf32>
    tpu.vector_store %arg4[%c0_5, %c0_6], %6 {strides = array<i32>} : memref<8x128xf32, #tpu.memory_space<vmem>>, vector<8x128xf32>,
    return
  }
  func.func @transform_0(%arg0: i32) -> (i32, i32) {
    %c0_i32 = arith.constant 0 : i32
    %c0_i32_0 = arith.constant 0 : i32
    return %arg0, %c0_i32 : i32, i32
  }
  func.func @transform_1(%arg0: i32) -> (i32, i32) {
    %c0_i32 = arith.constant 0 : i32
    %c0_i32_0 = arith.constant 0 : i32
    %c0_i32_1 = arith.constant 0 : i32
    return %c0_i32, %c0_i32_0 : i32, i32
  }
  func.func @transform_2(%arg0: i32) -> (i32, i32) {
    %c0_i32 = arith.constant 0 : i32
    %c0_i32_0 = arith.constant 0 : i32
    %c0_i32_1 = arith.constant 0 : i32
    return %c0_i32, %c0_i32_0 : i32, i32
  }
  func.func @transform_3(%arg0: i32) -> (i32, i32) {
    %c0_i32 = arith.constant 0 : i32
    %c0_i32_0 = arith.constant 0 : i32
    return %arg0, %c0_i32 : i32, i32
  }
}

</mosaic_0001>

<bundles_post_ra>
// kernel: mlp_forward_pallas.1
= control target key start
LH: loop header
LB: loop body
LE: loop exit
PB: predicated region body
PF: predicated region fallthrough
CT: control target
= control target key end

     0   :  { %8 = vsyncpa [#allocation3], 0  ;;  %s1090_s0 = inlined_call_operand.hbm [shape: f32[8,972], index: 0, kind: input, shape index: {}]   ;;  %s1091_s1 = inlined_call_operand.hbm [shape: bf16[972,128], index: 1, kind: input, shape index: {}]   ;;  %s1092_s2 = inlined_call_operand.vmem [shape: f32[1,128], index: 2, kind: input, shape index: {}]   ;;  %s1093_s3 = inlined_call_operand.hbm [shape: f32[8,128], index: 3, kind: output, shape index: {}]  }
   0x1   :  { %9 = vsyncpa [#allocation6], 0 }
   0x2   :  { %10 = vsyncpa [#allocation4], 0  ;;  %s1005_s12 = smov [#allocation2]   ;;  %s1006_s14 = smov [#allocation5]  }
   0x3   :  { %s17_s13 = sshll.u32 %s1005_s12, 4  ;;  %s26_s15 = sshll.u32 %s1006_s14, 4  ;;  %s18_s13 = int_to_ptr.vmem [resolvable:$true] %s17_s13  ;;  %s1031_s15 = int_to_ptr.vmem [resolvable:$true] %s26_s15 }
   0x4   :  { %s933_s18 = scalar_lea.hbm %s1090_s0, 1024 }
   0x5   :  { %p934_p0 = scmp.ne.s32.totalorder %s1090_s0, %s933_s18  ;;  %p937_p1 = scmp.lt.u32.totalorder %s933_s18, %s1090_s0 }
   0x7   :  { %p939_p2 = pnand %p937_p1, %p934_p0 }
   0x9   :  { %942 = shalt.err (!%p939_p2)
}
   0xa   :  { %s943_s23 = scalar_lea.vmem %s18_s13, 1024  ;;  %p948_p4 = scmp.lt.s32.totalorder %s18_s13, %s18_s13 }
   0xb   :  { %p944_p3 = scmp.ne.s32.totalorder %s18_s13, %s943_s23  ;;  %p949_p5 = scmp.lt.s32.totalorder %s943_s23, %s943_s23 }
   0xd   :  { %p950_p6 = por %p949_p5, %p948_p4 }
   0xf   :  { %p951_p7 = pnand %p950_p6, %p944_p3 }
  0x11   :  { %954 = shalt.err (!%p951_p7)
}
  0x12   :  { %20 = dma.hbm_to_vmem [thread:$0]  %s1090_s0, 1024, %s18_s13, [#allocation3]  }
  0x13   :  { %s955_s28 = scalar_lea.hbm %s1091_s1, 7808 }
  0x14   :  { %p956_p8 = scmp.ne.s32.totalorder %s1091_s1, %s955_s28  ;;  %p959_p9 = scmp.lt.u32.totalorder %s955_s28, %s1091_s1 }
  0x16   :  { %p961_p10 = pnand %p959_p9, %p956_p8 }
  0x18   :  { %964 = shalt.err (!%p961_p10)
}
  0x19   :  { %s965_s6 = scalar_lea.vmem %s1031_s15, 7808  ;;  %p970_p12 = scmp.lt.s32.totalorder %s1031_s15, %s1031_s15 }
  0x1a   :  { %p966_p11 = scmp.ne.s32.totalorder %s1031_s15, %s965_s6  ;;  %p971_p13 = scmp.lt.s32.totalorder %s965_s6, %s965_s6 }
  0x1c   :  { %p972_p0 = por %p971_p13, %p970_p12 }
  0x1e   :  { %p973_p1 = pnand %p972_p0, %p966_p11 }
  0x20   :  { %976 = shalt.err (!%p973_p1)
}
  0x21   :  { %s1007_s0 = smov 64   ;;  %s1008_s7 = smov 4  }
  0x22   :  { %32 = dma.hbm_to_vmem [thread:$0]  %s1091_s1, 7808, %s1031_s15, [#allocation6], %s1007_s0, %s1007_s0, %s1008_s7  }
  0x23   :  { %999 = dma.done.wait [#allocation3], 1024  }
  0x24   :  { %1000 = vsyncadd [#allocation3], 4294966272 }
  0x25   :  { %1001 = dma.done.wait [#allocation6], 7808  }
  0x26   :  { %1002 = vsyncadd [#allocation6], 4294959488  ;;  %v872_v0 = vld [vmem:[#allocation5 + $0x40] sm:$0xff]   ;;  %v876_v4 = vld [vmem:[#allocation5 + $0x48] sm:$0xff]   ;;  %v1009_v41 = vmov 0   ;;  %vm552_vm0 = vcmask 621568  }
  0x27   :  { %v873_v1 = vld [vmem:[#allocation5 + $0xc0] sm:$0xff]   ;;  %800 = vmatprep.subr.bf16.mxu0 %v872_v0  ;;  %v877_v5 = vld [vmem:[#allocation5 + $0xc8] sm:$0xff]   ;;  %v880_v8 = vld [vmem:[#allocation5 + $0x50] sm:$0xff]   ;;  %vm556_vm1 = vcmask 1045504   ;;  %s1010_s11 = smov [#allocation7]  }
  0x28   :  { %v874_v2 = vld [vmem:[#allocation5] sm:$0xff]   ;;  %822 = vmatprep.subr.bf16.mxu1 %v873_v1  ;;  %v878_v6 = vld [vmem:[#allocation5 + $0x8] sm:$0xff]   ;;  %v881_v9 = vld [vmem:[#allocation5 + $0xd0] sm:$0xff]   ;;  %s727_s12 = sshll.u32 %s1010_s11, 4  ;;  %s728_s12 = int_to_ptr.vmem [resolvable:$true] %s727_s12 }
  0x29   :  { %v875_v3 = vld [vmem:[#allocation5 + $0x80] sm:$0xff]   ;;  %801 = vmatpush3.bf16.msra.mxu0 %v874_v2  ;;  %v879_v7 = vld [vmem:[#allocation5 + $0x88] sm:$0xff]   ;;  %v882_v10 = vld [vmem:[#allocation5 + $0x10] sm:$0xff]   ;;  %p982_p3 = scmp.lt.s32.totalorder %s728_s12, %s728_s12 }
  0x2a   :  { %823 = vmatpush3.bf16.msra.mxu1 %v875_v3  ;;  %802 = vmatprep.subr.bf16.mxu0 %v876_v4  ;;  %v883_v11 = vld [vmem:[#allocation5 + $0x90] sm:$0xff]   ;;  %v884_v12 = vld [vmem:[#allocation5 + $0x58] sm:$0xff]   ;;  %v888_v16 = vld [vmem:[#allocation5 + $0x60] sm:$0xff]  }
  0x2b   :  { %824 = vmatprep.subr.bf16.mxu1 %v877_v5  ;;  %v885_v13 = vld [vmem:[#allocation5 + $0xd8] sm:$0xff]   ;;  %v889_v17 = vld [vmem:[#allocation5 + $0xe0] sm:$0xff]   ;;  %v892_v20 = vld [vmem:[#allocation5 + $0x68] sm:$0xff]  }
  0x2c   :  { %v886_v14 = vld [vmem:[#allocation5 + $0x18] sm:$0xff]   ;;  %v890_v18 = vld [vmem:[#allocation5 + $0x20] sm:$0xff]   ;;  %v893_v21 = vld [vmem:[#allocation5 + $0xe8] sm:$0xff]  }
  0x2d   :  { %803 = vmatpush3.bf16.msra.mxu0 %v878_v6  ;;  %v887_v15 = vld [vmem:[#allocation5 + $0x98] sm:$0xff]   ;;  %v891_v19 = vld [vmem:[#allocation5 + $0xa0] sm:$0xff]   ;;  %v894_v22 = vld [vmem:[#allocation5 + $0x28] sm:$0xff]  }
  0x2e   :  { %825 = vmatpush3.bf16.msra.mxu1 %v879_v7  ;;  %804 = vmatprep.subr.bf16.mxu0 %v880_v8  ;;  %v895_v23 = vld [vmem:[#allocation5 + $0xa8] sm:$0xff]   ;;  %v896_v24 = vld [vmem:[#allocation5 + $0x70] sm:$0xff]   ;;  %v900_v28 = vld [vmem:[#allocation5 + $0x78] sm:$0xff]  }
  0x2f   :  { %826 = vmatprep.subr.bf16.mxu1 %v881_v9  ;;  %v897_v25 = vld [vmem:[#allocation5 + $0xf0] sm:$0xff]   ;;  %v901_v29 = vld [vmem:[#allocation5 + $0xf8] sm:$0xff]   ;;  %v43_v32 = vld [vmem:[#allocation2 + $0x8] sm:$0xff] }
  0x30   :  { %v898_v26 = vld [vmem:[#allocation5 + $0x30] sm:$0xff]   ;;  %v902_v30 = vld [vmem:[#allocation5 + $0x38] sm:$0xff]   ;;  %v42_v34 = vld [vmem:[#allocation2] sm:$0xff]  ;;  %v51_v35 = vpack.c.bf16 %v43_v32, %v43_v32 }
  0x31   :  { %805 = vmatpush3.bf16.msra.mxu0 %v882_v10  ;;  %v899_v27 = vld [vmem:[#allocation5 + $0xb0] sm:$0xff]   ;;  %v903_v31 = vld [vmem:[#allocation5 + $0xb8] sm:$0xff]   ;;  %v50_v37 = vpack.c.bf16 %v42_v34, %v42_v34  ;;  %v904_v40 = vld [vmem:[#allocation5 + $0x140] sm:$0xff]  }
  0x32   :  { %827 = vmatpush3.bf16.msra.mxu1 %v883_v11  ;;  %806 = vmatprep.subr.bf16.mxu0 %v884_v12  ;;  %v45_v33 = vld [vmem:[#allocation2 + $0x18] sm:$0xff]  ;;  %v44_v38 = vld [vmem:[#allocation2 + $0x10] sm:$0xff]  ;;  %v905_v42 = vld [vmem:[#allocation5 + $0x100] sm:$0xff]  }
  0x33   :  { %828 = vmatprep.subr.bf16.mxu1 %v885_v13  ;;  %v53_v36 = vpack.c.bf16 %v45_v33, %v45_v33  ;;  %v52_v39 = vpack.c.bf16 %v44_v38, %v44_v38  ;;  %592 = vmatprep.mubr.bf16.mxu0 %v51_v35  ;;  %v906_v43 = vld [vmem:[#allocation5 + $0x180] sm:$0xff]   ;;  %v907_v44 = vld [vmem:[#allocation5 + $0x148] sm:$0xff]   ;;  %v910_v47 = vld [vmem:[#allocation5 + $0x150] sm:$0xff]  }
  0x34   :  { %v908_v45 = vld [vmem:[#allocation5 + $0x108] sm:$0xff]   ;;  %v911_v48 = vld [vmem:[#allocation5 + $0x110] sm:$0xff]   ;;  %v913_v50 = vld [vmem:[#allocation5 + $0x158] sm:$0xff]  }
  0x35   :  { %807 = vmatpush3.bf16.msra.mxu0 %v886_v14  ;;  %632 = vmatprep.mubr.bf16.mxu1 %v53_v36  ;;  %v909_v46 = vld [vmem:[#allocation5 + $0x188] sm:$0xff]   ;;  %v912_v49 = vld [vmem:[#allocation5 + $0x190] sm:$0xff]   ;;  %v914_v51 = vld [vmem:[#allocation5 + $0x118] sm:$0xff]  }
  0x36   :  { %829 = vmatpush3.bf16.msra.mxu1 %v887_v15  ;;  %808 = vmatprep.subr.bf16.mxu0 %v888_v16  ;;  %v915_v52 = vld [vmem:[#allocation5 + $0x198] sm:$0xff]   ;;  %v916_v53 = vld [vmem:[#allocation5 + $0x160] sm:$0xff]   ;;  %v919_v56 = vld [vmem:[#allocation5 + $0x168] sm:$0xff]  }
  0x37   :  { %830 = vmatprep.subr.bf16.mxu1 %v889_v17  ;;  %v917_v54 = vld [vmem:[#allocation5 + $0x120] sm:$0xff]   ;;  %v920_v57 = vld [vmem:[#allocation5 + $0x128] sm:$0xff]   ;;  %v922_v59 = vld [vmem:[#allocation5 + $0x170] sm:$0xff]  }
  0x38   :  { %v918_v55 = vld [vmem:[#allocation5 + $0x1a0] sm:$0xff]   ;;  %v921_v58 = vld [vmem:[#allocation5 + $0x1a8] sm:$0xff]   ;;  %v923_v60 = vld [vmem:[#allocation5 + $0x130] sm:$0xff]  }
  0x39   :  { %809 = vmatpush3.bf16.msra.mxu0 %v890_v18  ;;  %v47_v61 = vld [vmem:[#allocation2 + $0x28] sm:$0xff]  ;;  %v924_v62 = vld [vmem:[#allocation5 + $0x1b0] sm:$0xff]   ;;  %v925_v0 = vld [vmem:[#allocation5 + $0x178] sm:$0xff]  }
  0x3a   :  { %831 = vmatpush3.bf16.msra.mxu1 %v891_v19  ;;  %810 = vmatprep.subr.bf16.mxu0 %v892_v20  ;;  %v55_v63 = vpack.c.bf16 %v47_v61, %v47_v61  ;;  %v926_v1 = vld [vmem:[#allocation5 + $0x138] sm:$0xff]   ;;  %v46_v3 = vld [vmem:[#allocation2 + $0x20] sm:$0xff]  ;;  %v929_v8 = vld [vmem:[#allocation5 + $0x1c8] sm:$0xff]  }
  0x3b   :  { %832 = vmatprep.subr.bf16.mxu1 %v893_v21  ;;  %v927_v2 = vld [vmem:[#allocation5 + $0x1b8] sm:$0xff]   ;;  %v54_v6 = vpack.c.bf16 %v46_v3, %v46_v3  ;;  %v928_v7 = vld [vmem:[#allocation5 + $0x1c0] sm:$0xff]   ;;  %v930_v9 = vld [vmem:[#allocation5 + $0x1d0] sm:$0xff]  }
  0x3c   :  { %v49_v4 = vld [vmem:[#allocation2 + $0x38] sm:$0xff]  ;;  %v932_v11 = vld [vmem:[#allocation5 + $0x1e0] sm:$0x3f]   ;;  %v48_v12 = vld [vmem:[#allocation2 + $0x30] sm:$0xff] }
  0x3d   :  { %811 = vmatpush3.bf16.msra.mxu0 %v894_v22  ;;  %v57_v5 = vpack.c.bf16 %v49_v4, %v49_v4  ;;  %v931_v10 = vld [vmem:[#allocation5 + $0x1d8] sm:$0xff]   ;;  %v558_v13 = vsel %vm556_vm1, %v932_v11, 0  ;;  %v56_v14 = vpack.c.bf16 %v48_v12, %v48_v12  ;;  %v737_v17 = vld [vmem:[%s1092_s2] ss:$0 sm:$0xff]  ;;  %s977_s2 = scalar_lea.vmem %s728_s12, 128 }
  0x3e   :  { %833 = vmatpush3.bf16.msra.mxu1 %v895_v23  ;;  %812 = vmatprep.subr.bf16.mxu0 %v896_v24  ;;  %p978_p2 = scmp.ne.s32.totalorder %s728_s12, %s977_s2  ;;  %p983_p4 = scmp.lt.s32.totalorder %s977_s2, %s977_s2 }
  0x3f   :  { %834 = vmatprep.subr.bf16.mxu1 %v897_v25 }
  0x40   :  { %p984_p5 = por %p983_p4, %p982_p3 }
  0x41   :  { %813 = vmatpush3.bf16.msra.mxu0 %v898_v26 }
  0x42   :  { %835 = vmatpush3.bf16.msra.mxu1 %v899_v27  ;;  %814 = vmatprep.subr.bf16.mxu0 %v900_v28  ;;  %p985_p6 = pnand %p984_p5, %p978_p2 }
  0x43   :  { %836 = vmatprep.subr.bf16.mxu1 %v901_v29 }
  0x45   :  { %815 = vmatpush3.bf16.msra.mxu0 %v902_v30 }
  0x46   :  { %837 = vmatpush3.bf16.msra.mxu1 %v903_v31  ;;  %844 = vmatprep.subr.bf16.mxu0 %v904_v40 }
  0x47   :  { %680 = vmatprep.subr.bf16.mxu1 %v1009_v41 }
  0x48   :  { %593 = vmatmul.mubr.bf16.vlgmr.msra.gmra.mrb[0].mxu0 %v50_v37 }
  0x49   :  { %633 = vmatmul.mubr.bf16.vlgmr.msra.gmra.mrb[0].mxu1 %v52_v39  ;;  %845 = vmatpush3.bf16.msra.mxu0 %v905_v42 }
  0x4a   :  { %681 = vmatpush1.bf16.msra.mxu1 %v906_v43  ;;  %846 = vmatprep.subr.bf16.mxu0 %v907_v44 }
  0x4b   :  { %682 = vmatprep.subr.bf16.mxu1 %v1009_v41  ;;  %672 = vmatprep.mubr.bf16.mxu0 %v55_v63 }
  0x4c   :  { %799 = vmatprep.mubr.msk.bf16.mxu1 %vm552_vm0, %v57_v5 }
  0x4d   :  { %847 = vmatpush3.bf16.msra.mxu0 %v908_v45 }
  0x4e   :  { %683 = vmatpush1.bf16.msra.mxu1 %v909_v46  ;;  %848 = vmatprep.subr.bf16.mxu0 %v910_v47 }
  0x4f   :  { %684 = vmatprep.subr.bf16.mxu1 %v1009_v41 }
  0x51   :  { %849 = vmatpush3.bf16.msra.mxu0 %v911_v48 }
  0x52   :  { %685 = vmatpush1.bf16.msra.mxu1 %v912_v49  ;;  %850 = vmatprep.subr.bf16.mxu0 %v913_v50 }
  0x53   :  { %686 = vmatprep.subr.bf16.mxu1 %v1009_v41 }
  0x55   :  { %851 = vmatpush3.bf16.msra.mxu0 %v914_v51 }
  0x56   :  { %687 = vmatpush1.bf16.msra.mxu1 %v915_v52  ;;  %852 = vmatprep.subr.bf16.mxu0 %v916_v53 }
  0x57   :  { %688 = vmatprep.subr.bf16.mxu1 %v1009_v41 }
  0x59   :  { %853 = vmatpush3.bf16.msra.mxu0 %v917_v54 }
  0x5a   :  { %689 = vmatpush1.bf16.msra.mxu1 %v918_v55  ;;  %854 = vmatprep.subr.bf16.mxu0 %v919_v56 }
  0x5b   :  { %690 = vmatprep.subr.bf16.mxu1 %v1009_v41 }
  0x5d   :  { %855 = vmatpush3.bf16.msra.mxu0 %v920_v57 }
  0x5e   :  { %691 = vmatpush1.bf16.msra.mxu1 %v921_v58  ;;  %856 = vmatprep.subr.bf16.mxu0 %v922_v59 }
  0x5f   :  { %692 = vmatprep.subr.bf16.mxu1 %v1009_v41 }
  0x61   :  { %857 = vmatpush3.bf16.msra.mxu0 %v923_v60 }
  0x62   :  { %693 = vmatpush1.bf16.msra.mxu1 %v924_v62  ;;  %858 = vmatprep.subr.bf16.mxu0 %v925_v0 }
  0x63   :  { %694 = vmatprep.subr.bf16.mxu1 %v1009_v41 }
  0x65   :  { %859 = vmatpush3.bf16.msra.mxu0 %v926_v1 }
  0x66   :  { %695 = vmatpush1.bf16.msra.mxu1 %v927_v2 }
  0x67   :  { %696 = vmatprep.subr.bf16.mxu1 %v1009_v41 }
  0x68   :  { %673 = vmatmul.mubr.bf16.vlgmr.msra.gmra.mrb[4].mxu0 %v54_v6 }
  0x6a   :  { %697 = vmatpush1.bf16.msra.mxu1 %v928_v7 }
  0x6b   :  { %698 = vmatprep.subr.bf16.mxu1 %v1009_v41 }
  0x6e   :  { %699 = vmatpush1.bf16.msra.mxu1 %v929_v8 }
  0x6f   :  { %700 = vmatprep.subr.bf16.mxu1 %v1009_v41 }
  0x72   :  { %701 = vmatpush1.bf16.msra.mxu1 %v930_v9 }
  0x73   :  { %702 = vmatprep.subr.bf16.mxu1 %v1009_v41 }
  0x76   :  { %703 = vmatpush1.bf16.msra.mxu1 %v931_v10 }
  0x77   :  { %704 = vmatprep.subr.bf16.mxu1 %v1009_v41 }
  0x7a   :  { %705 = vmatpush1.bf16.msra.mxu1 %v558_v13 }
  0x7d   :  { %713 = vmatmul.mubr.bf16.vlgmr.msra.gmra.mrb[4].mxu1 %v56_v14 }
 0x11b   :  { %v816_v15 = vpop.f32.mrb[0].mxu0 }
 0x11c   :  { %v838_v16 = vpop.f32.mrb[0].mxu1  ;;  %v817_v18 = vpop.f32.mrb[1].mxu0 }
 0x11d   :  { %v839_v19 = vpop.f32.mrb[1].mxu1  ;;  %v818_v20 = vadd.f32 %v817_v18, %v816_v15  ;;  %v819_v23 = vpop.f32.mrb[2].mxu0 }
 0x11e   :  { %v840_v21 = vadd.f32 %v839_v19, %v838_v16  ;;  %v841_v22 = vpop.f32.mrb[2].mxu1  ;;  %v820_v25 = vpop.f32.mrb[3].mxu0 }
 0x11f   :  { %v842_v24 = vpop.f32.mrb[3].mxu1  ;;  %v595_v26 = vadd.f32 %v818_v20, %v737_v17 }
 0x121   :  { %v635_v27 = vadd.f32 %v840_v21, %v595_v26 }
 0x13b   :  { %v860_v28 = vpop.f32.mrb[4].mxu0 }
 0x13c   :  { %v861_v29 = vpop.f32.mrb[5].mxu0 }
 0x13d   :  { %v862_v30 = vadd.f32 %v861_v29, %v860_v28  ;;  %v863_v31 = vpop.f32.mrb[6].mxu0 }
 0x13e   :  { %v864_v32 = vpop.f32.mrb[7].mxu0 }
 0x13f   :  { %v675_v33 = vadd.f32 %v862_v30, %v635_v27 }
 0x150   :  { %v714_v34 = vpop.f32.mrb[4].mxu1 }
 0x151   :  { %v715_v35 = vadd.f32 %v714_v34, %v675_v33  ;;  %v716_v36 = vpop.f32.mrb[5].mxu1 }
 0x152   :  { %v717_v37 = vpop.f32.mrb[6].mxu1 }
 0x153   :  { %720 = vst [vmem:[#allocation7] sm:$0xff] %v715_v35  ;;  %v718_v38 = vpop.f32.mrb[7].mxu1 }
 0x154   :  { %988 = shalt.err (!%p985_p6)
}
 0x155   :  { %s989_s15 = scalar_lea.hbm %s1093_s3, 128 }
 0x156   :  { %p990_p7 = scmp.ne.s32.totalorder %s1093_s3, %s989_s15  ;;  %p993_p8 = scmp.lt.u32.totalorder %s989_s15, %s1093_s3 }
 0x158   :  { %p995_p9 = pnand %p993_p8, %p990_p7 }
 0x15a   :  { %998 = shalt.err (!%p995_p9)
}
 0x15b   :  { %730 = dma.vmem_to_hbm [thread:$0]  %s728_s12, 128, %s1093_s3, [#allocation4]  }
 0x15c   :  { %1003 = dma.done.wait [#allocation4], 128  }
 0x15d   :  { %1004 = vsyncadd [#allocation4], 4294967168 }
 0x15e   :  { %734 = vsyncpa [#allocation3], 1 }
 0x15f   :  { %735 = vsyncpa [#allocation6], 1 }
 0x160   :  { %736 = vsyncpa [#allocation4], 1 }

</bundles_post_ra>
